<compile_context>
chip_gen: v6e
topology: v6e:2x2x1
jax: 0.10.0
libtpu: 0.0.40
codegen_flags: <defaults>
</compile_context>

<pallas_src>
import jax
import jax.numpy as jnp
import numpy as np
from jax import lax
from jax.experimental import pallas as pl
from jax.experimental.pallas import tpu as pltpu


def lstm_component_kernel(value_ids_ref,    # SMEM (T,)      int32
                          type_ids_ref,     # SMEM (T,)      int32
                          value_tbl_ref,    # VMEM (Vv, 4H)  f32   (scaled)
                          type_tbl_ref,     # VMEM (Vt, 4H)  f32   (scaled)
                          bias_ref,         # VMEM (1, 4H)   f32   (scaled)
                          w_hh_ref,         # VMEM (H, 4H)   bf16  (scaled)
                          h0_ref, c0_ref,   # VMEM (1, H)    f32
                          out_ref):         # VMEM (1, (CW+2)*H) f32
    T = value_ids_ref.shape[0]
    H = h0_ref.shape[1]
    CW = out_ref.shape[1] // H - 2

    bias = bias_ref[...]                                    # (1, 4H)

    # ---- fused embedding gather: pre_gates[t] = value_row + type_row + bias.
    # These only depend on the SMEM ids, not on h, so this whole block is off
    # the serial recurrence chain (free filler for the scheduler).
    pre_gates = []
    for t in range(T):
        v_row = value_tbl_ref[pl.ds(value_ids_ref[t], 1), :]   # (1, 4H)
        t_row = type_tbl_ref[pl.ds(type_ids_ref[t], 1), :]     # (1, 4H)
        pre_gates.append(v_row + t_row + bias)

    w_hh = w_hh_ref[...]                                     # (H, 4H) bf16
    h = h0_ref[...]                                          # (1, H)  f32
    c = c0_ref[...]                                          # (1, H)  f32
    outs = []

    # ---- fully unrolled recurrence (T static): per step one bf16 MXU matmul,
    # one full-width tanh, one tanh(c), and a handful of VPU ops.
    for t in range(T):
        z = pre_gates[t] + jnp.dot(h.astype(jnp.bfloat16), w_hh,
                                   preferred_element_type=jnp.float32)  # (1,4H)
        y = jnp.tanh(z)                      # single EUP push for all 4 gates
        act = y * 0.5 + 0.5                  # sigmoid lanes (i, f, o) recovered
        i_g = act[:, 0 * H:1 * H]
        f_g = act[:, 1 * H:2 * H]
        g_g = y[:, 2 * H:3 * H]              # tanh lanes taken directly from y
        o_g = act[:, 3 * H:4 * H]

        c = f_g * c + i_g * g_g
        h = o_g * jnp.tanh(c)

        if t >= T - CW:                      # static condition — no branch
            outs.append(h)

    # ---- single lane-dense store: [last CW hidden states | h_final | c_final]
    out_ref[...] = jnp.concatenate(outs + [h, c], axis=1)


def prepare_params(params):
    """One-time parameter preparation (hoisted out of the per-call path).

    Folds:  * embedding @ W_ih^T pre-multiplication (per-token gate tables)
            * b_ih + b_hh
            * the 0.5 tanh-trick pre-scale on the i/f/o gate lane groups
            * W_hh transpose + bf16 cast for the recurrent MXU matmul.
    """
    w_hh = params["w_hh"].astype(jnp.float32)          # (4H, H) PyTorch layout
    w_ih = params["w_ih"].astype(jnp.float32)          # (4H, E)
    H = w_hh.shape[1]
    value_dim = params["value_emb"].shape[1]

    # gate order i, f, g, o ; scale i/f/o by 0.5 so sigmoid = 0.5*tanh(.)+0.5
    scale = jnp.concatenate([jnp.full((H,), 0.5, jnp.float32),
                             jnp.full((H,), 0.5, jnp.float32),
                             jnp.ones((H,), jnp.float32),
                             jnp.full((H,), 0.5, jnp.float32)])

    w_ih_value = w_ih[:, :value_dim]                   # embeds = [value | type]
    w_ih_type = w_ih[:, value_dim:]

    value_gate_tbl = jnp.dot(params["value_emb"].astype(jnp.float32),
                             w_ih_value.T,
                             precision=lax.Precision.HIGHEST) * scale
    type_gate_tbl = jnp.dot(params["type_emb"].astype(jnp.float32),
                            w_ih_type.T,
                            precision=lax.Precision.HIGHEST) * scale
    bias = ((params["b_ih"] + params["b_hh"]).astype(jnp.float32)
            * scale).reshape(1, 4 * H)
    w_hh_t = (w_hh.T * scale).astype(jnp.bfloat16)     # (H, 4H) bf16

    return {
        "value_gate_tbl": value_gate_tbl,              # (Vv, 4H) f32
        "type_gate_tbl": type_gate_tbl,                # (Vt, 4H) f32
        "bias": bias,                                  # (1, 4H)  f32
        "w_hh_t": w_hh_t,                              # (H, 4H)  bf16
        "hidden_dim": H,
    }


def lstm_component_forward(sentence, hc, prep, context_window):
    """sentence = (type_ids (T,), value_ids (T,)); hc = (h0 (1,1,H), c0 (1,1,H))."""
    type_ids, value_ids = sentence
    h0, c0 = hc
    H = prep["hidden_dim"]
    T = type_ids.shape[0]
    CW = context_window
    assert 1 <= CW <= T, "context_window must satisfy 1 <= CW <= seq_len"
    # The PyTorch forward forces batch == 1 via .view(len, 1, -1).
    assert h0.shape == (1, 1, H) and c0.shape == (1, 1, H), "batch must be 1"

    vmem = pl.BlockSpec(memory_space=pltpu.MemorySpace.VMEM)
    smem = pl.BlockSpec(memory_space=pltpu.MemorySpace.SMEM)

    out = pl.pallas_call(
        lstm_component_kernel,
        out_shape=jax.ShapeDtypeStruct((1, (CW + 2) * H), jnp.float32),
        in_specs=[smem, smem, vmem, vmem, vmem, vmem, vmem, vmem],
        out_specs=vmem,
    )(
        value_ids.astype(jnp.int32), type_ids.astype(jnp.int32),
        prep["value_gate_tbl"], prep["type_gate_tbl"], prep["bias"],
        prep["w_hh_t"],
        h0.reshape(1, H), c0.reshape(1, H),
    )

    # restore PyTorch shapes: (CW, 1, H), (1, 1, H), (1, 1, H)
    lstm_out = out[:, :CW * H].reshape(CW, 1, H)
    lstm_h = out[:, CW * H:(CW + 1) * H].reshape(1, 1, H)
    lstm_c = out[:, (CW + 1) * H:].reshape(1, 1, H)
    return lstm_out, lstm_h, lstm_c


def reference_forward(sentence, hc, params, context_window):
    """Pure-JAX reference matching the PyTorch forward (eval-mode dropout)."""
    type_ids, value_ids = sentence
    h0, c0 = hc
    embeds = jnp.concatenate(
        [params["value_emb"][value_ids], params["type_emb"][type_ids]], axis=1)
    w_ih, w_hh = params["w_ih"], params["w_hh"]
    bias = params["b_ih"] + params["b_hh"]
    H = w_hh.shape[1]

    def cell(carry, x):
        h, c = carry
        gates = x @ w_ih.T + h @ w_hh.T + bias
        i = jax.nn.sigmoid(gates[0:H])
        f = jax.nn.sigmoid(gates[H:2 * H])
        g = jnp.tanh(gates[2 * H:3 * H])
        o = jax.nn.sigmoid(gates[3 * H:4 * H])
        c_new = f * c + i * g
        h_new = o * jnp.tanh(c_new)
        return (h_new, c_new), h_new

    (h_fin, c_fin), hs = lax.scan(cell, (h0.reshape(H), c0.reshape(H)), embeds)
    return hs[-context_window:][:, None, :], h_fin[None, None, :], c_fin[None, None, :]


if __name__ == "__main__":
    # module hyper-parameters (small, consistent with the forward)
    vocab_value_size, value_dim = 64, 16
    vocab_type_size, type_dim = 32, 16
    hidden_dim = 32
    batch_size = 1          # forward reshapes to (T, 1, D) -> batch is 1
    context_window = 4
    seq_len = 8

    key = jax.random.PRNGKey(0)
    k1, k2, k3, k4, k5, k6, k7, k8 = jax.random.split(key, 8)

    bound = 1.0 / np.sqrt(hidden_dim)
    params = {
        "value_emb": jax.random.normal(k1, (vocab_value_size, value_dim), jnp.float32),
        "type_emb": jax.random.normal(k2, (vocab_type_size, type_dim), jnp.float32),
        "w_ih": jax.random.uniform(k3, (4 * hidden_dim, value_dim + type_dim),
                                   jnp.float32, -bound, bound),
        "w_hh": jax.random.uniform(k4, (4 * hidden_dim, hidden_dim),
                                   jnp.float32, -bound, bound),
        "b_ih": jax.random.uniform(k5, (4 * hidden_dim,), jnp.float32, -bound, bound),
        "b_hh": jax.random.uniform(k6, (4 * hidden_dim,), jnp.float32, -bound, bound),
    }

    type_ids = jax.random.randint(k7, (seq_len,), 0, vocab_type_size, jnp.int32)
    value_ids = jax.random.randint(k8, (seq_len,), 0, vocab_value_size, jnp.int32)
    sentence = (type_ids, value_ids)

    # initHidden(): zeros (1, batch, hidden)
    h0 = jnp.zeros((1, batch_size, hidden_dim), jnp.float32)
    c0 = jnp.zeros((1, batch_size, hidden_dim), jnp.float32)

    prep = prepare_params(params)          # one-time, outside the per-call path
    jax.block_until_ready(prep)

    lstm_out, lstm_h, lstm_c = lstm_component_forward(
        sentence, (h0, c0), prep, context_window)
    jax.block_until_ready((lstm_out, lstm_h, lstm_c))

    ref_out, ref_h, ref_c = reference_forward(sentence, (h0, c0), params, context_window)
    # Tolerance relaxed vs. the pure-f32 version because the recurrent matmul
    # now runs in bf16 (per perf review); error over an H=32 contraction and
    # T=8 steps is well inside 2e-2.
    np.testing.assert_allclose(np.asarray(lstm_out), np.asarray(ref_out), atol=2e-2, rtol=2e-2)
    np.testing.assert_allclose(np.asarray(lstm_h), np.asarray(ref_h), atol=2e-2, rtol=2e-2)
    np.testing.assert_allclose(np.asarray(lstm_c), np.asarray(ref_c), atol=2e-2, rtol=2e-2)

    assert lstm_out.shape == (context_window, 1, hidden_dim)
    assert lstm_h.shape == (1, 1, hidden_dim) and lstm_c.shape == (1, 1, hidden_dim)

    print("KERNEL_OK")
</pallas_src>

<mosaic_0001>
module attributes {stable_mosaic.version = 11 : i64} {
  func.func @lstm_component_kernel(%arg0: memref<8xi32, #tpu.memory_space<smem>>, %arg1: memref<8xi32, #tpu.memory_space<smem>>, %arg2: memref<64x128xf32, #tpu.memory_space<vmem>>, %arg3: memref<32x128xf32, #tpu.memory_space<vmem>>, %arg4: memref<1x128xf32, #tpu.memory_space<vmem>>, %arg5: memref<32x128xbf16, #tpu.memory_space<vmem>>, %arg6: memref<1x32xf32, #tpu.memory_space<vmem>>, %arg7: memref<1x32xf32, #tpu.memory_space<vmem>>, %arg8: memref<1x192xf32, #tpu.memory_space<vmem>>) attributes {dimension_semantics = [], scalar_prefetch = 0 : i64, scratch_operands = 0 : i64, tpu.core_type = #tpu.core_type<tc>} {
    %c0 = arith.constant 0 : index
    %c0_0 = arith.constant 0 : index
    %0 = vector.load %arg4[%c0, %c0_0] : memref<1x128xf32, #tpu.memory_space<vmem>>, vector<1x128xf32>
    %c0_1 = arith.constant 0 : index
    %1 = memref.load %arg0[%c0_1] : memref<8xi32, #tpu.memory_space<smem>>
    %2 = arith.index_cast %1 : i32 to index
    %c0_2 = arith.constant 0 : index
    %3 = vector.load %arg2[%2, %c0_2] : memref<64x128xf32, #tpu.memory_space<vmem>>, vector<1x128xf32>
    %c0_3 = arith.constant 0 : index
    %4 = memref.load %arg1[%c0_3] : memref<8xi32, #tpu.memory_space<smem>>
    %5 = arith.index_cast %4 : i32 to index
    %c0_4 = arith.constant 0 : index
    %6 = vector.load %arg3[%5, %c0_4] : memref<32x128xf32, #tpu.memory_space<vmem>>, vector<1x128xf32>
    %7 = arith.addf %3, %6 : vector<1x128xf32>
    %8 = arith.addf %7, %0 : vector<1x128xf32>
    %c1 = arith.constant 1 : index
    %9 = memref.load %arg0[%c1] : memref<8xi32, #tpu.memory_space<smem>>
    %10 = arith.index_cast %9 : i32 to index
    %c0_5 = arith.constant 0 : index
    %11 = vector.load %arg2[%10, %c0_5] : memref<64x128xf32, #tpu.memory_space<vmem>>, vector<1x128xf32>
    %c1_6 = arith.constant 1 : index
    %12 = memref.load %arg1[%c1_6] : memref<8xi32, #tpu.memory_space<smem>>
    %13 = arith.index_cast %12 : i32 to index
    %c0_7 = arith.constant 0 : index
    %14 = vector.load %arg3[%13, %c0_7] : memref<32x128xf32, #tpu.memory_space<vmem>>, vector<1x128xf32>
    %15 = arith.addf %11, %14 : vector<1x128xf32>
    %16 = arith.addf %15, %0 : vector<1x128xf32>
    %c2 = arith.constant 2 : index
    %17 = memref.load %arg0[%c2] : memref<8xi32, #tpu.memory_space<smem>>
    %18 = arith.index_cast %17 : i32 to index
    %c0_8 = arith.constant 0 : index
    %19 = vector.load %arg2[%18, %c0_8] : memref<64x128xf32, #tpu.memory_space<vmem>>, vector<1x128xf32>
    %c2_9 = arith.constant 2 : index
    %20 = memref.load %arg1[%c2_9] : memref<8xi32, #tpu.memory_space<smem>>
    %21 = arith.index_cast %20 : i32 to index
    %c0_10 = arith.constant 0 : index
    %22 = vector.load %arg3[%21, %c0_10] : memref<32x128xf32, #tpu.memory_space<vmem>>, vector<1x128xf32>
    %23 = arith.addf %19, %22 : vector<1x128xf32>
    %24 = arith.addf %23, %0 : vector<1x128xf32>
    %c3 = arith.constant 3 : index
    %25 = memref.load %arg0[%c3] : memref<8xi32, #tpu.memory_space<smem>>
    %26 = arith.index_cast %25 : i32 to index
    %c0_11 = arith.constant 0 : index
    %27 = vector.load %arg2[%26, %c0_11] : memref<64x128xf32, #tpu.memory_space<vmem>>, vector<1x128xf32>
    %c3_12 = arith.constant 3 : index
    %28 = memref.load %arg1[%c3_12] : memref<8xi32, #tpu.memory_space<smem>>
    %29 = arith.index_cast %28 : i32 to index
    %c0_13 = arith.constant 0 : index
    %30 = vector.load %arg3[%29, %c0_13] : memref<32x128xf32, #tpu.memory_space<vmem>>, vector<1x128xf32>
    %31 = arith.addf %27, %30 : vector<1x128xf32>
    %32 = arith.addf %31, %0 : vector<1x128xf32>
    %c4 = arith.constant 4 : index
    %33 = memref.load %arg0[%c4] : memref<8xi32, #tpu.memory_space<smem>>
    %34 = arith.index_cast %33 : i32 to index
    %c0_14 = arith.constant 0 : index
    %35 = vector.load %arg2[%34, %c0_14] : memref<64x128xf32, #tpu.memory_space<vmem>>, vector<1x128xf32>
    %c4_15 = arith.constant 4 : index
    %36 = memref.load %arg1[%c4_15] : memref<8xi32, #tpu.memory_space<smem>>
    %37 = arith.index_cast %36 : i32 to index
    %c0_16 = arith.constant 0 : index
    %38 = vector.load %arg3[%37, %c0_16] : memref<32x128xf32, #tpu.memory_space<vmem>>, vector<1x128xf32>
    %39 = arith.addf %35, %38 : vector<1x128xf32>
    %40 = arith.addf %39, %0 : vector<1x128xf32>
    %c5 = arith.constant 5 : index
    %41 = memref.load %arg0[%c5] : memref<8xi32, #tpu.memory_space<smem>>
    %42 = arith.index_cast %41 : i32 to index
    %c0_17 = arith.constant 0 : index
    %43 = vector.load %arg2[%42, %c0_17] : memref<64x128xf32, #tpu.memory_space<vmem>>, vector<1x128xf32>
    %c5_18 = arith.constant 5 : index
    %44 = memref.load %arg1[%c5_18] : memref<8xi32, #tpu.memory_space<smem>>
    %45 = arith.index_cast %44 : i32 to index
    %c0_19 = arith.constant 0 : index
    %46 = vector.load %arg3[%45, %c0_19] : memref<32x128xf32, #tpu.memory_space<vmem>>, vector<1x128xf32>
    %47 = arith.addf %43, %46 : vector<1x128xf32>
    %48 = arith.addf %47, %0 : vector<1x128xf32>
    %c6 = arith.constant 6 : index
    %49 = memref.load %arg0[%c6] : memref<8xi32, #tpu.memory_space<smem>>
    %50 = arith.index_cast %49 : i32 to index
    %c0_20 = arith.constant 0 : index
    %51 = vector.load %arg2[%50, %c0_20] : memref<64x128xf32, #tpu.memory_space<vmem>>, vector<1x128xf32>
    %c6_21 = arith.constant 6 : index
    %52 = memref.load %arg1[%c6_21] : memref<8xi32, #tpu.memory_space<smem>>
    %53 = arith.index_cast %52 : i32 to index
    %c0_22 = arith.constant 0 : index
    %54 = vector.load %arg3[%53, %c0_22] : memref<32x128xf32, #tpu.memory_space<vmem>>, vector<1x128xf32>
    %55 = arith.addf %51, %54 : vector<1x128xf32>
    %56 = arith.addf %55, %0 : vector<1x128xf32>
    %c7 = arith.constant 7 : index
    %57 = memref.load %arg0[%c7] : memref<8xi32, #tpu.memory_space<smem>>
    %58 = arith.index_cast %57 : i32 to index
    %c0_23 = arith.constant 0 : index
    %59 = vector.load %arg2[%58, %c0_23] : memref<64x128xf32, #tpu.memory_space<vmem>>, vector<1x128xf32>
    %c7_24 = arith.constant 7 : index
    %60 = memref.load %arg1[%c7_24] : memref<8xi32, #tpu.memory_space<smem>>
    %61 = arith.index_cast %60 : i32 to index
    %c0_25 = arith.constant 0 : index
    %62 = vector.load %arg3[%61, %c0_25] : memref<32x128xf32, #tpu.memory_space<vmem>>, vector<1x128xf32>
    %63 = arith.addf %59, %62 : vector<1x128xf32>
    %64 = arith.addf %63, %0 : vector<1x128xf32>
    %c0_26 = arith.constant 0 : index
    %c0_27 = arith.constant 0 : index
    %65 = vector.load %arg5[%c0_26, %c0_27] : memref<32x128xbf16, #tpu.memory_space<vmem>>, vector<32x128xbf16>
    %c0_28 = arith.constant 0 : index
    %c0_29 = arith.constant 0 : index
    %66 = vector.load %arg6[%c0_28, %c0_29] : memref<1x32xf32, #tpu.memory_space<vmem>>, vector<1x32xf32>
    %c0_30 = arith.constant 0 : index
    %c0_31 = arith.constant 0 : index
    %67 = vector.load %arg7[%c0_30, %c0_31] : memref<1x32xf32, #tpu.memory_space<vmem>>, vector<1x32xf32>
    %68 = arith.truncf %66 : vector<1x32xf32> to vector<1x32xbf16>
    %cst = arith.constant dense<0.000000e+00> : vector<1x128xf32>
    %69 = tpu.matmul %68, %65, %cst {dimension_numbers = #tpu.dot_dimension_numbers<[1], [0], [0], [1], [0, 0, 1, 1], [], []>} : vector<1x32xbf16>, vector<32x128xbf16>, vector<1x128xf32> -> vector<1x128xf32>
    %70 = arith.addf %8, %69 : vector<1x128xf32>
    %71 = math.tanh %70 : vector<1x128xf32>
    %cst_32 = arith.constant 5.000000e-01 : f32
    %72 = vector.broadcast %cst_32 : f32 to vector<1x128xf32>
    %73 = arith.mulf %71, %72 : vector<1x128xf32>
    %cst_33 = arith.constant 5.000000e-01 : f32
    %74 = vector.broadcast %cst_33 : f32 to vector<1x128xf32>
    %75 = arith.addf %73, %74 : vector<1x128xf32>
    %76 = vector.extract_strided_slice %75 {offsets = [0, 0], sizes = [1, 32], strides = [1, 1]} : vector<1x128xf32> to vector<1x32xf32>
    %77 = vector.extract_strided_slice %75 {offsets = [0, 32], sizes = [1, 32], strides = [1, 1]} : vector<1x128xf32> to vector<1x32xf32>
    %78 = vector.extract_strided_slice %71 {offsets = [0, 64], sizes = [1, 32], strides = [1, 1]} : vector<1x128xf32> to vector<1x32xf32>
    %79 = vector.extract_strided_slice %75 {offsets = [0, 96], sizes = [1, 32], strides = [1, 1]} : vector<1x128xf32> to vector<1x32xf32>
    %80 = arith.mulf %77, %67 : vector<1x32xf32>
    %81 = arith.mulf %76, %78 : vector<1x32xf32>
    %82 = arith.addf %80, %81 : vector<1x32xf32>
    %83 = math.tanh %82 : vector<1x32xf32>
    %84 = arith.mulf %79, %83 : vector<1x32xf32>
    %85 = arith.truncf %84 : vector<1x32xf32> to vector<1x32xbf16>
    %cst_34 = arith.constant dense<0.000000e+00> : vector<1x128xf32>
    %86 = tpu.matmul %85, %65, %cst_34 {dimension_numbers = #tpu.dot_dimension_numbers<[1], [0], [0], [1], [0, 0, 1, 1], [], []>} : vector<1x32xbf16>, vector<32x128xbf16>, vector<1x128xf32> -> vector<1x128xf32>
    %87 = arith.addf %16, %86 : vector<1x128xf32>
    %88 = math.tanh %87 : vector<1x128xf32>
    %cst_35 = arith.constant 5.000000e-01 : f32
    %89 = vector.broadcast %cst_35 : f32 to vector<1x128xf32>
    %90 = arith.mulf %88, %89 : vector<1x128xf32>
    %cst_36 = arith.constant 5.000000e-01 : f32
    %91 = vector.broadcast %cst_36 : f32 to vector<1x128xf32>
    %92 = arith.addf %90, %91 : vector<1x128xf32>
    %93 = vector.extract_strided_slice %92 {offsets = [0, 0], sizes = [1, 32], strides = [1, 1]} : vector<1x128xf32> to vector<1x32xf32>
    %94 = vector.extract_strided_slice %92 {offsets = [0, 32], sizes = [1, 32], strides = [1, 1]} : vector<1x128xf32> to vector<1x32xf32>
    %95 = vector.extract_strided_slice %88 {offsets = [0, 64], sizes = [1, 32], strides = [1, 1]} : vector<1x128xf32> to vector<1x32xf32>
    %96 = vector.extract_strided_slice %92 {offsets = [0, 96], sizes = [1, 32], strides = [1, 1]} : vector<1x128xf32> to vector<1x32xf32>
    %97 = arith.mulf %94, %82 : vector<1x32xf32>
    %98 = arith.mulf %93, %95 : vector<1x32xf32>
    %99 = arith.addf %97, %98 : vector<1x32xf32>
    %100 = math.tanh %99 : vector<1x32xf32>
    %101 = arith.mulf %96, %100 : vector<1x32xf32>
    %102 = arith.truncf %101 : vector<1x32xf32> to vector<1x32xbf16>
    %cst_37 = arith.constant dense<0.000000e+00> : vector<1x128xf32>
    %103 = tpu.matmul %102, %65, %cst_37 {dimension_numbers = #tpu.dot_dimension_numbers<[1], [0], [0], [1], [0, 0, 1, 1], [], []>} : vector<1x32xbf16>, vector<32x128xbf16>, vector<1x128xf32> -> vector<1x128xf32>
    %104 = arith.addf %24, %103 : vector<1x128xf32>
    %105 = math.tanh %104 : vector<1x128xf32>
    %cst_38 = arith.constant 5.000000e-01 : f32
    %106 = vector.broadcast %cst_38 : f32 to vector<1x128xf32>
    %107 = arith.mulf %105, %106 : vector<1x128xf32>
    %cst_39 = arith.constant 5.000000e-01 : f32
    %108 = vector.broadcast %cst_39 : f32 to vector<1x128xf32>
    %109 = arith.addf %107, %108 : vector<1x128xf32>
    %110 = vector.extract_strided_slice %109 {offsets = [0, 0], sizes = [1, 32], strides = [1, 1]} : vector<1x128xf32> to vector<1x32xf32>
    %111 = vector.extract_strided_slice %109 {offsets = [0, 32], sizes = [1, 32], strides = [1, 1]} : vector<1x128xf32> to vector<1x32xf32>
    %112 = vector.extract_strided_slice %105 {offsets = [0, 64], sizes = [1, 32], strides = [1, 1]} : vector<1x128xf32> to vector<1x32xf32>
    %113 = vector.extract_strided_slice %109 {offsets = [0, 96], sizes = [1, 32], strides = [1, 1]} : vector<1x128xf32> to vector<1x32xf32>
    %114 = arith.mulf %111, %99 : vector<1x32xf32>
    %115 = arith.mulf %110, %112 : vector<1x32xf32>
    %116 = arith.addf %114, %115 : vector<1x32xf32>
    %117 = math.tanh %116 : vector<1x32xf32>
    %118 = arith.mulf %113, %117 : vector<1x32xf32>
    %119 = arith.truncf %118 : vector<1x32xf32> to vector<1x32xbf16>
    %cst_40 = arith.constant dense<0.000000e+00> : vector<1x128xf32>
    %120 = tpu.matmul %119, %65, %cst_40 {dimension_numbers = #tpu.dot_dimension_numbers<[1], [0], [0], [1], [0, 0, 1, 1], [], []>} : vector<1x32xbf16>, vector<32x128xbf16>, vector<1x128xf32> -> vector<1x128xf32>
    %121 = arith.addf %32, %120 : vector<1x128xf32>
    %122 = math.tanh %121 : vector<1x128xf32>
    %cst_41 = arith.constant 5.000000e-01 : f32
    %123 = vector.broadcast %cst_41 : f32 to vector<1x128xf32>
    %124 = arith.mulf %122, %123 : vector<1x128xf32>
    %cst_42 = arith.constant 5.000000e-01 : f32
    %125 = vector.broadcast %cst_42 : f32 to vector<1x128xf32>
    %126 = arith.addf %124, %125 : vector<1x128xf32>
    %127 = vector.extract_strided_slice %126 {offsets = [0, 0], sizes = [1, 32], strides = [1, 1]} : vector<1x128xf32> to vector<1x32xf32>
    %128 = vector.extract_strided_slice %126 {offsets = [0, 32], sizes = [1, 32], strides = [1, 1]} : vector<1x128xf32> to vector<1x32xf32>
    %129 = vector.extract_strided_slice %122 {offsets = [0, 64], sizes = [1, 32], strides = [1, 1]} : vector<1x128xf32> to vector<1x32xf32>
    %130 = vector.extract_strided_slice %126 {offsets = [0, 96], sizes = [1, 32], strides = [1, 1]} : vector<1x128xf32> to vector<1x32xf32>
    %131 = arith.mulf %128, %116 : vector<1x32xf32>
    %132 = arith.mulf %127, %129 : vector<1x32xf32>
    %133 = arith.addf %131, %132 : vector<1x32xf32>
    %134 = math.tanh %133 : vector<1x32xf32>
    %135 = arith.mulf %130, %134 : vector<1x32xf32>
    %136 = arith.truncf %135 : vector<1x32xf32> to vector<1x32xbf16>
    %cst_43 = arith.constant dense<0.000000e+00> : vector<1x128xf32>
    %137 = tpu.matmul %136, %65, %cst_43 {dimension_numbers = #tpu.dot_dimension_numbers<[1], [0], [0], [1], [0, 0, 1, 1], [], []>} : vector<1x32xbf16>, vector<32x128xbf16>, vector<1x128xf32> -> vector<1x128xf32>
    %138 = arith.addf %40, %137 : vector<1x128xf32>
    %139 = math.tanh %138 : vector<1x128xf32>
    %cst_44 = arith.constant 5.000000e-01 : f32
    %140 = vector.broadcast %cst_44 : f32 to vector<1x128xf32>
    %141 = arith.mulf %139, %140 : vector<1x128xf32>
    %cst_45 = arith.constant 5.000000e-01 : f32
    %142 = vector.broadcast %cst_45 : f32 to vector<1x128xf32>
    %143 = arith.addf %141, %142 : vector<1x128xf32>
    %144 = vector.extract_strided_slice %143 {offsets = [0, 0], sizes = [1, 32], strides = [1, 1]} : vector<1x128xf32> to vector<1x32xf32>
    %145 = vector.extract_strided_slice %143 {offsets = [0, 32], sizes = [1, 32], strides = [1, 1]} : vector<1x128xf32> to vector<1x32xf32>
    %146 = vector.extract_strided_slice %139 {offsets = [0, 64], sizes = [1, 32], strides = [1, 1]} : vector<1x128xf32> to vector<1x32xf32>
    %147 = vector.extract_strided_slice %143 {offsets = [0, 96], sizes = [1, 32], strides = [1, 1]} : vector<1x128xf32> to vector<1x32xf32>
    %148 = arith.mulf %145, %133 : vector<1x32xf32>
    %149 = arith.mulf %144, %146 : vector<1x32xf32>
    %150 = arith.addf %148, %149 : vector<1x32xf32>
    %151 = math.tanh %150 : vector<1x32xf32>
    %152 = arith.mulf %147, %151 : vector<1x32xf32>
    %153 = arith.truncf %152 : vector<1x32xf32> to vector<1x32xbf16>
    %cst_46 = arith.constant dense<0.000000e+00> : vector<1x128xf32>
    %154 = tpu.matmul %153, %65, %cst_46 {dimension_numbers = #tpu.dot_dimension_numbers<[1], [0], [0], [1], [0, 0, 1, 1], [], []>} : vector<1x32xbf16>, vector<32x128xbf16>, vector<1x128xf32> -> vector<1x128xf32>
    %155 = arith.addf %48, %154 : vector<1x128xf32>
    %156 = math.tanh %155 : vector<1x128xf32>
    %cst_47 = arith.constant 5.000000e-01 : f32
    %157 = vector.broadcast %cst_47 : f32 to vector<1x128xf32>
    %158 = arith.mulf %156, %157 : vector<1x128xf32>
    %cst_48 = arith.constant 5.000000e-01 : f32
    %159 = vector.broadcast %cst_48 : f32 to vector<1x128xf32>
    %160 = arith.addf %158, %159 : vector<1x128xf32>
    %161 = vector.extract_strided_slice %160 {offsets = [0, 0], sizes = [1, 32], strides = [1, 1]} : vector<1x128xf32> to vector<1x32xf32>
    %162 = vector.extract_strided_slice %160 {offsets = [0, 32], sizes = [1, 32], strides = [1, 1]} : vector<1x128xf32> to vector<1x32xf32>
    %163 = vector.extract_strided_slice %156 {offsets = [0, 64], sizes = [1, 32], strides = [1, 1]} : vector<1x128xf32> to vector<1x32xf32>
    %164 = vector.extract_strided_slice %160 {offsets = [0, 96], sizes = [1, 32], strides = [1, 1]} : vector<1x128xf32> to vector<1x32xf32>
    %165 = arith.mulf %162, %150 : vector<1x32xf32>
    %166 = arith.mulf %161, %163 : vector<1x32xf32>
    %167 = arith.addf %165, %166 : vector<1x32xf32>
    %168 = math.tanh %167 : vector<1x32xf32>
    %169 = arith.mulf %164, %168 : vector<1x32xf32>
    %170 = arith.truncf %169 : vector<1x32xf32> to vector<1x32xbf16>
    %cst_49 = arith.constant dense<0.000000e+00> : vector<1x128xf32>
    %171 = tpu.matmul %170, %65, %cst_49 {dimension_numbers = #tpu.dot_dimension_numbers<[1], [0], [0], [1], [0, 0, 1, 1], [], []>} : vector<1x32xbf16>, vector<32x128xbf16>, vector<1x128xf32> -> vector<1x128xf32>
    %172 = arith.addf %56, %171 : vector<1x128xf32>
    %173 = math.tanh %172 : vector<1x128xf32>
    %cst_50 = arith.constant 5.000000e-01 : f32
    %174 = vector.broadcast %cst_50 : f32 to vector<1x128xf32>
    %175 = arith.mulf %173, %174 : vector<1x128xf32>
    %cst_51 = arith.constant 5.000000e-01 : f32
    %176 = vector.broadcast %cst_51 : f32 to vector<1x128xf32>
    %177 = arith.addf %175, %176 : vector<1x128xf32>
    %178 = vector.extract_strided_slice %177 {offsets = [0, 0], sizes = [1, 32], strides = [1, 1]} : vector<1x128xf32> to vector<1x32xf32>
    %179 = vector.extract_strided_slice %177 {offsets = [0, 32], sizes = [1, 32], strides = [1, 1]} : vector<1x128xf32> to vector<1x32xf32>
    %180 = vector.extract_strided_slice %173 {offsets = [0, 64], sizes = [1, 32], strides = [1, 1]} : vector<1x128xf32> to vector<1x32xf32>
    %181 = vector.extract_strided_slice %177 {offsets = [0, 96], sizes = [1, 32], strides = [1, 1]} : vector<1x128xf32> to vector<1x32xf32>
    %182 = arith.mulf %179, %167 : vector<1x32xf32>
    %183 = arith.mulf %178, %180 : vector<1x32xf32>
    %184 = arith.addf %182, %183 : vector<1x32xf32>
    %185 = math.tanh %184 : vector<1x32xf32>
    %186 = arith.mulf %181, %185 : vector<1x32xf32>
    %187 = arith.truncf %186 : vector<1x32xf32> to vector<1x32xbf16>
    %cst_52 = arith.constant dense<0.000000e+00> : vector<1x128xf32>
    %188 = tpu.matmul %187, %65, %cst_52 {dimension_numbers = #tpu.dot_dimension_numbers<[1], [0], [0], [1], [0, 0, 1, 1], [], []>} : vector<1x32xbf16>, vector<32x128xbf16>, vector<1x128xf32> -> vector<1x128xf32>
    %189 = arith.addf %64, %188 : vector<1x128xf32>
    %190 = math.tanh %189 : vector<1x128xf32>
    %cst_53 = arith.constant 5.000000e-01 : f32
    %191 = vector.broadcast %cst_53 : f32 to vector<1x128xf32>
    %192 = arith.mulf %190, %191 : vector<1x128xf32>
    %cst_54 = arith.constant 5.000000e-01 : f32
    %193 = vector.broadcast %cst_54 : f32 to vector<1x128xf32>
    %194 = arith.addf %192, %193 : vector<1x128xf32>
    %195 = vector.extract_strided_slice %194 {offsets = [0, 0], sizes = [1, 32], strides = [1, 1]} : vector<1x128xf32> to vector<1x32xf32>
    %196 = vector.extract_strided_slice %194 {offsets = [0, 32], sizes = [1, 32], strides = [1, 1]} : vector<1x128xf32> to vector<1x32xf32>
    %197 = vector.extract_strided_slice %190 {offsets = [0, 64], sizes = [1, 32], strides = [1, 1]} : vector<1x128xf32> to vector<1x32xf32>
    %198 = vector.extract_strided_slice %194 {offsets = [0, 96], sizes = [1, 32], strides = [1, 1]} : vector<1x128xf32> to vector<1x32xf32>
    %199 = arith.mulf %196, %184 : vector<1x32xf32>
    %200 = arith.mulf %195, %197 : vector<1x32xf32>
    %201 = arith.addf %199, %200 : vector<1x32xf32>
    %202 = math.tanh %201 : vector<1x32xf32>
    %203 = arith.mulf %198, %202 : vector<1x32xf32>
    %204 = tpu.concatenate %152, %169, %186, %203, %203, %201 in 1 : vector<1x32xf32>, vector<1x32xf32>, vector<1x32xf32>, vector<1x32xf32>, vector<1x32xf32>, vector<1x32xf32> -> vector<1x192xf32>
    %c0_55 = arith.constant 0 : index
    %c0_56 = arith.constant 0 : index
    %205 = vector.load %arg8[%c0_55, %c0_56] : memref<1x192xf32, #tpu.memory_space<vmem>>, vector<1x192xf32>
    tpu.vector_store %arg8[%c0_55, %c0_56], %204 {strides = array<i32>} : memref<1x192xf32, #tpu.memory_space<vmem>>, vector<1x192xf32>,
    return
  }
}

</mosaic_0001>

<bundles_post_ra>
// kernel: tpu_custom_call.1
= control target key start
LH: loop header
LB: loop body
LE: loop exit
PB: predicated region body
PF: predicated region fallthrough
CT: control target
= control target key end

     0   :  { %13 = vsyncpa [#allocation5], 0  ;;  %s1285_s0 = inlined_call_operand.hbm [shape: s32[8], index: 0, kind: input, shape index: {}]   ;;  %s1286_s1 = inlined_call_operand.vmem [shape: s32[8], index: 1, kind: input, shape index: {}]   ;;  %s1287_s2 = inlined_call_operand.hbm [shape: f32[64,128], index: 2, kind: input, shape index: {}]   ;;  %s1288_s3 = inlined_call_operand.hbm [shape: f32[32,128], index: 3, kind: input, shape index: {}]   ;;  %s1289_s4 = inlined_call_operand.vmem [shape: f32[1,128], index: 4, kind: input, shape index: {}]   ;;  %s1290_s5 = inlined_call_operand.hbm [shape: bf16[32,128], index: 5, kind: input, shape index: {}]   ;;  %s1291_s6 = inlined_call_operand.vmem [shape: f32[1,32], index: 6, kind: input, shape index: {}]   ;;  %s1292_s7 = inlined_call_operand.vmem [shape: f32[1,32], index: 7, kind: input, shape index: {}]   ;;  %s1293_s8 = inlined_call_operand.hbm [shape: f32[1,192], index: 8, kind: output, shape index: {}]  }
   0x1   :  { %14 = vsyncpa [#allocation6], 0 }
   0x2   :  { %15 = vsyncpa [#allocation3], 0 }
   0x3   :  { %16 = vsyncpa [#allocation10], 0 }
   0x4   :  { %17 = vsyncpa [#allocation4], 0  ;;  %s1079_s27 = smov [#allocation9]   ;;  %s32_s9 = sshll.u32 %s1286_s1, 4  ;;  %s33_s9 = int_to_ptr.vmem [resolvable:$true] %s32_s9 }
   0x5   :  { %s53_s28 = sshll.u32 %s1079_s27, 4  ;;  %s54_s28 = int_to_ptr.vmem [resolvable:$true] %s53_s28 }
   0x6   :  { %s977_s10 = scalar_lea.vmem %s54_s28, 512  ;;  %p982_p1 = scmp.lt.s32.totalorder %s54_s28, %s54_s28 }
   0x7   :  { %p978_p0 = scmp.ne.s32.totalorder %s54_s28, %s977_s10  ;;  %p983_p2 = scmp.lt.s32.totalorder %s977_s10, %s977_s10 }
   0x9   :  { %p984_p3 = por %p983_p2, %p982_p1 }
   0xb   :  { %p985_p4 = pnand %p984_p3, %p978_p0 }
   0xd   :  { %988 = shalt.err (!%p985_p4)
}
   0xe   :  { %s1080_s11 = smov 128   ;;  %s1081_s12 = smov 8  }
   0xf   :  { %59 = dma.hbm_to_vmem [thread:$0]  %s1288_s3, 512, %s54_s28, [#allocation10], %s1080_s11, %s1080_s11, %s1081_s12  }
  0x10   :  { %s1082_s15 = smov [#allocation2]   ;;  %s997_s1 = scalar_lea.vmem %s33_s9, 16 }
  0x11   :  { %25 = dma.hbm_to_smem %s1285_s0, 16, %s1082_s15, [#allocation5]  }
  0x12   :  { %p998_p5 = scmp.ne.s32.totalorder %s33_s9, %s997_s1  ;;  %p1002_p6 = scmp.lt.s32.totalorder %s33_s9, %s33_s9 }
  0x13   :  { %p1003_p7 = scmp.lt.s32.totalorder %s997_s1, %s997_s1 }
  0x15   :  { %p1004_p8 = por %p1003_p7, %p1002_p6 }
  0x17   :  { %p1005_p9 = pnand %p1004_p8, %p998_p5 }
  0x19   :  { %1008 = shalt.err (!%p1005_p9)
}
  0x1a   :  { %s1083_s18 = smov [#allocation7]   ;;  %s1084_s19 = smov [#allocation8]  }
  0x1b   :  { %35 = dma.vmem_to_smem %s33_s9, 16, %s1083_s18, [#allocation6]  }
  0x1c   :  { %s41_s20 = sshll.u32 %s1084_s19, 4  ;;  %s1085_s21 = smov [#allocation11]   ;;  %s42_s20 = int_to_ptr.vmem [resolvable:$true] %s41_s20 }
  0x1d   :  { %s67_s22 = sshll.u32 %s1085_s21, 4  ;;  %s1017_s3 = scalar_lea.vmem %s42_s20, 1024  ;;  %s68_s22 = int_to_ptr.vmem [resolvable:$true] %s67_s22 }
  0x1e   :  { %p1018_p10 = scmp.ne.s32.totalorder %s42_s20, %s1017_s3  ;;  %p1022_p11 = scmp.lt.s32.totalorder %s42_s20, %s42_s20 }
  0x1f   :  { %p1023_p12 = scmp.lt.s32.totalorder %s1017_s3, %s1017_s3 }
  0x21   :  { %p1024_p13 = por %p1023_p12, %p1022_p11 }
  0x23   :  { %p1025_p0 = pnand %p1024_p13, %p1018_p10 }
  0x25   :  { %1028 = shalt.err (!%p1025_p0)
}
  0x26   :  { %47 = dma.hbm_to_vmem [thread:$0]  %s1287_s2, 1024, %s42_s20, [#allocation3], %s1080_s11, %s1080_s11, %s1081_s12  }
  0x27   :  { %s1037_s24 = scalar_lea.vmem %s68_s22, 256  ;;  %p1042_p2 = scmp.lt.s32.totalorder %s68_s22, %s68_s22 }
  0x28   :  { %p1038_p1 = scmp.ne.s32.totalorder %s68_s22, %s1037_s24  ;;  %p1043_p3 = scmp.lt.s32.totalorder %s1037_s24, %s1037_s24 }
  0x2a   :  { %p1044_p4 = por %p1043_p3, %p1042_p2 }
  0x2c   :  { %p1045_p5 = pnand %p1044_p4, %p1038_p1 }
  0x2e   :  { %1048 = shalt.err (!%p1045_p5)
}
  0x2f   :  { %s1086_s25 = smov 64   ;;  %s1087_s26 = smov 4  }
  0x30   :  { %73 = dma.hbm_to_vmem [thread:$0]  %s1290_s5, 256, %s68_s22, [#allocation10], %s1086_s25, %s1086_s25, %s1087_s26  }
  0x31   :  { %1069 = dma.done.wait [#allocation5], 16  }
  0x32   :  { %1070 = vsyncadd [#allocation5], 4294967280 }
  0x33   :  { %1071 = dma.done.wait [#allocation6], 16  }
  0x34   :  { %1072 = vsyncadd [#allocation6], 4294967280 }
  0x35   :  { %1073 = dma.done.wait [#allocation3], 1024  }
  0x36   :  { %1074 = vsyncadd [#allocation3], 4294966272 }
  0x37   :  { %1075 = dma.done.wait [#allocation10], 768  }
  0x38   :  { %1076 = vsyncadd [#allocation10], 4294966528 }
  0x39   :  { %93 = sfence }
  0x3a   :  { %v1156_v0 = vld [vmem:[#allocation11 + $0x8] sm:$0xff]   ;;  %v1088_v1 = vmov 0.0   ;;  %v1161_v2 = vld [vmem:[#allocation11] sm:$0xff]   ;;  %vm1089_vm0 = vmmov 0   ;;  %vm179_vm1 = vcmask 261120   ;;  %s99_s29 = sld [smem:[#allocation7]] }
  0x3b   :  { %856 = vmatprep.subr.bf16.mxu0 %v1088_v1  ;;  %864 = vmatprep.subr.bf16.mxu1 %v1088_v1  ;;  %v164_v3 = vld [vmem:[%s1291_s6] sm:$0x1]  ;;  %s96_s6 = sld [smem:[#allocation2]]  ;;  %s1090_s14 = smov 32   ;;  %vm745_vm2 = vcmask 523264   ;;  %vm747_vm3 = vcmask 785408  }
  0x3c   :  { %857 = vmatpush3.bf16.msra.mxu0 %v1156_v0  ;;  %860 = vmatprep.mubr.msk.bf16.mxu0 %vm1089_vm0, %v1088_v1  ;;  %v166_v4 = vpack.c.bf16 %v164_v3, %v164_v3  ;;  %v1187_v8 = vld [vmem:[%s1289_s4] sm:$0x1]  ;;  %s807_s4 = sld [smem:[#allocation2 + $0x1]] }
  0x3d   :  { %858 = vmatprep.subr.bf16.mxu0 %v1088_v1  ;;  %865 = vmatpush3.bf16.msra.mxu1 %v1156_v0  ;;  %v824_v16 = vld [vmem:[%s1292_s7] ss:$0 sm:$0xff]  ;;  %s808_s7 = sld [smem:[#allocation7 + $0x1]] }
  0x3e   :  { %866 = vmatprep.subr.bf16.mxu1 %v1088_v1  ;;  %868 = vmatprep.mubr.msk.bf16.mxu1 %vm1089_vm0, %v1088_v1  ;;  %s809_s17 = sld [smem:[#allocation2 + $0x2]] }
  0x3f   :  { %s810_s1 = sld [smem:[#allocation7 + $0x2]] }
  0x40   :  { %859 = vmatpush3.bf16.msra.mxu0 %v1161_v2  ;;  %s100_s9 = scalar_lea.vmem [#allocation9], %s99_s29  ;;  %s811_s20 = sld [smem:[#allocation2 + $0x3]] }
  0x41   :  { %867 = vmatpush3.bf16.msra.mxu1 %v1161_v2  ;;  %872 = vmatprep.subr.bf16.mxu0 %v1088_v1  ;;  %s97_s30 = scalar_lea.vmem [#allocation8], %s96_s6  ;;  %v101_v6 = vld [vmem:[%s100_s9] sm:$0x1]  ;;  %s812_s21 = sld [smem:[#allocation7 + $0x3]] }
  0x42   :  { %880 = vmatprep.subr.bf16.mxu1 %v1088_v1  ;;  %v98_v5 = vld [vmem:[%s97_s30] sm:$0x1]  ;;  %s105_s15 = scalar_lea.vmem [#allocation8], %s807_s4  ;;  %s813_s0 = sld [smem:[#allocation2 + $0x4]] }
  0x43   :  { %861 = vmatmul.mubr.msk.bf16.vlgmr.msra.gmra.mxu0 %vm179_vm1, %v166_v4  ;;  %v102_v7 = vadd.f32 %v101_v6, %v98_v5  ;;  %v106_v30 = vld [vmem:[%s105_s15] sm:$0x1]  ;;  %s108_s16 = scalar_lea.vmem [#allocation9], %s808_s7  ;;  %s814_s23 = sld [smem:[#allocation7 + $0x4]] }
  0x44   :  { %873 = vmatpush3.bf16.msra.mxu0 %v1156_v0  ;;  %876 = vmatprep.mubr.msk.bf16.mxu0 %vm1089_vm0, %v1088_v1  ;;  %v109_v31 = vld [vmem:[%s108_s16] sm:$0x1]  ;;  %s113_s18 = scalar_lea.vmem [#allocation8], %s809_s17  ;;  %s815_s27 = sld [smem:[#allocation2 + $0x5]] }
  0x45   :  { %874 = vmatprep.subr.bf16.mxu0 %v1088_v1  ;;  %v103_v9 = vadd.f32 %v102_v7, %v1187_v8  ;;  %v110_v32 = vadd.f32 %v109_v31, %v106_v30  ;;  %v114_v52 = vld [vmem:[%s113_s18] sm:$0x1]  ;;  %s116_s19 = scalar_lea.vmem [#allocation9], %s810_s1  ;;  %s816_s28 = sld [smem:[#allocation7 + $0x5]] }
  0x46   :  { %v117_v53 = vld [vmem:[%s116_s19] sm:$0x1]  ;;  %s121_s22 = scalar_lea.vmem [#allocation8], %s811_s20  ;;  %s817_s6 = sld [smem:[#allocation2 + $0x6]] }
  0x47   :  { %v111_v33 = vadd.f32 %v110_v32, %v1187_v8  ;;  %v118_v54 = vadd.f32 %v117_v53, %v114_v52  ;;  %s124_s3 = scalar_lea.vmem [#allocation9], %s812_s21  ;;  %s818_s29 = sld [smem:[#allocation7 + $0x6]] }
  0x48   :  { %875 = vmatpush3.bf16.msra.mxu0 %v1161_v2  ;;  %s129_s24 = scalar_lea.vmem [#allocation8], %s813_s0  ;;  %s819_s10 = sld [smem:[#allocation2 + $0x7]] }
  0x49   :  { %888 = vmatprep.subr.bf16.mxu0 %v1088_v1  ;;  %v119_v55 = vadd.f32 %v118_v54, %v1187_v8  ;;  %s132_s26 = scalar_lea.vmem [#allocation9], %s814_s23  ;;  %s820_s11 = sld [smem:[#allocation7 + $0x7]] }
  0x4a   :  { %s137_s2 = scalar_lea.vmem [#allocation8], %s815_s27  ;;  %s1091_s4 = smov 96  }
  0x4b   :  { %s140_s5 = scalar_lea.vmem [#allocation9], %s816_s28 }
  0x4c   :  { %s145_s30 = scalar_lea.vmem [#allocation8], %s817_s6 }
  0x4d   :  { %s148_s9 = scalar_lea.vmem [#allocation9], %s818_s29 }
  0x4e   :  { %s153_s12 = scalar_lea.vmem [#allocation8], %s819_s10 }
  0x4f   :  { %s156_s13 = scalar_lea.vmem [#allocation9], %s820_s11 }
 0x103   :  { %v217_v10 = vpop.f32.mrf.mxu0 }
 0x104   :  { %v223_v11 = vadd.f32 %v217_v10, %v103_v9 }
 0x105   :  { %v862_v12 = vpop.f32.mrf.mxu0 }
 0x106   :  { %937 = vtanh.f32 %v223_v11 }
 0x107   :  { %v220_v13 = vpop.f32.mrf.mxu0 }
 0x109   :  { %v863_v14 = vpop.f32.mrf.mxu0 }
 0x10a   :  { %v122_v14 = vld [vmem:[%s121_s22] sm:$0x1] }
 0x113   :  { %v938_v15 = vpop.eup %937 }
 0x114   :  { %237 = vrot.lane.b32.xlu0 %v938_v15, %s1086_s25  ;;  %v225_v17 = vmul.f32 0.5, %v938_v15  ;;  %v125_v15 = vld [vmem:[%s124_s3] sm:$0x1] }
 0x116   :  { %v226_v18 = vadd.f32 0.5, %v225_v17 }
 0x118   :  { %232 = vrot.lane.b32.xlu0 %v824_v16, %s1090_s14  ;;  %v126_v16 = vadd.f32 %v125_v15, %v122_v14 }
 0x11a   :  { %v127_v17 = vadd.f32 %v126_v16, %v1187_v8 }
 0x186   :  { %v238_v19 = vpop.permute.xlu0 %237 }
 0x187   :  { %v240_v20 = vmul.f32 %v238_v19, %v226_v18 }
 0x189   :  { %242 = vrot.lane.b32.xlu1 %v240_v20, %s1090_s14 }
 0x18a   :  { %v233_v21 = vpop.permute.xlu0 %232 }
 0x18b   :  { %v235_v22 = vmul.f32 %v233_v21, %v226_v18 }
 0x1fb   :  { %v243_v23 = vpop.permute.xlu1 %242 }
 0x1fc   :  { %v245_v24 = vadd.f32 %v243_v23, %v235_v22 }
 0x1fe   :  { %939 = vtanh.f32 %v245_v24 }
 0x20b   :  { %v940_v25 = vpop.eup %939 }
 0x20c   :  { %248 = vrot.lane.b32.xlu1 %v940_v25, %s1086_s25 }
 0x27e   :  { %v249_v26 = vpop.permute.xlu1 %248 }
 0x27f   :  { %v251_v27 = vmul.f32 %v249_v26, %v226_v18 }
 0x281   :  { %v252_v28 = vpack.c.bf16 %v251_v27, %v251_v27 }
 0x283   :  { %254 = vrot.lane.b32.xlu0 %v252_v28, %s1090_s14 }
 0x2f5   :  { %v255_v29 = vpop.permute.xlu0 %254 }
 0x2f6   :  { %869 = vmatmul.mubr.msk.bf16.vlgmr.msra.gmra.mxu1 %vm179_vm1, %v255_v29 }
 0x2f7   :  { %881 = vmatpush3.bf16.msra.mxu1 %v1156_v0  ;;  %884 = vmatprep.mubr.msk.bf16.mxu1 %vm1089_vm0, %v1088_v1 }
 0x2f8   :  { %882 = vmatprep.subr.bf16.mxu1 %v1088_v1 }
 0x2fb   :  { %883 = vmatpush3.bf16.msra.mxu1 %v1161_v2 }
 0x2fc   :  { %896 = vmatprep.subr.bf16.mxu1 %v1088_v1 }
 0x3b6   :  { %v293_v34 = vpop.f32.mrf.mxu1 }
 0x3b7   :  { %v299_v35 = vadd.f32 %v293_v34, %v111_v33 }
 0x3b8   :  { %v870_v36 = vpop.f32.mrf.mxu1 }
 0x3b9   :  { %941 = vtanh.f32 %v299_v35  ;;  %v130_v36 = vld [vmem:[%s129_s24] sm:$0x1] }
 0x3ba   :  { %v296_v37 = vpop.f32.mrf.mxu1 }
 0x3bb   :  { %v133_v37 = vld [vmem:[%s132_s26] sm:$0x1] }
 0x3bc   :  { %v871_v38 = vpop.f32.mrf.mxu1 }
 0x3bd   :  { %v134_v38 = vadd.f32 %v133_v37, %v130_v36 }
 0x3c6   :  { %v942_v39 = vpop.eup %941 }
 0x3c7   :  { %305 = vrot.lane.b32.xlu1 %v942_v39, %s1086_s25  ;;  %v301_v40 = vmul.f32 0.5, %v942_v39  ;;  %v135_v39 = vadd.f32 %v134_v38, %v1187_v8 }
 0x3c9   :  { %v302_v41 = vadd.f32 0.5, %v301_v40 }
 0x3cb   :  { %v303_v44 = vmul.f32 %v302_v41, %v245_v24 }
 0x439   :  { %v306_v42 = vpop.permute.xlu1 %305 }
 0x43a   :  { %v308_v43 = vmul.f32 %v306_v42, %v302_v41 }
 0x43c   :  { %310 = vrot.lane.b32.xlu0 %v308_v43, %s1090_s14 }
 0x4ae   :  { %v311_v45 = vpop.permute.xlu0 %310 }
 0x4af   :  { %v313_v46 = vadd.f32 %v311_v45, %v303_v44 }
 0x4b1   :  { %943 = vtanh.f32 %v313_v46 }
 0x4be   :  { %v944_v47 = vpop.eup %943 }
 0x4bf   :  { %316 = vrot.lane.b32.xlu1 %v944_v47, %s1086_s25 }
 0x531   :  { %v317_v48 = vpop.permute.xlu1 %316 }
 0x532   :  { %v319_v49 = vmul.f32 %v317_v48, %v302_v41 }
 0x534   :  { %v320_v50 = vpack.c.bf16 %v319_v49, %v319_v49 }
 0x536   :  { %322 = vrot.lane.b32.xlu0 %v320_v50, %s1090_s14 }
 0x5a8   :  { %v323_v51 = vpop.permute.xlu0 %322 }
 0x5a9   :  { %877 = vmatmul.mubr.msk.bf16.vlgmr.msra.gmra.mxu0 %vm179_vm1, %v323_v51 }
 0x5aa   :  { %889 = vmatpush3.bf16.msra.mxu0 %v1156_v0  ;;  %892 = vmatprep.mubr.msk.bf16.mxu0 %vm1089_vm0, %v1088_v1 }
 0x5ab   :  { %890 = vmatprep.subr.bf16.mxu0 %v1088_v1 }
 0x5ae   :  { %891 = vmatpush3.bf16.msra.mxu0 %v1161_v2 }
 0x5af   :  { %904 = vmatprep.subr.bf16.mxu0 %v1088_v1 }
 0x669   :  { %v361_v56 = vpop.f32.mrf.mxu0 }
 0x66a   :  { %v367_v57 = vadd.f32 %v361_v56, %v119_v55 }
 0x66b   :  { %v878_v58 = vpop.f32.mrf.mxu0 }
 0x66c   :  { %945 = vtanh.f32 %v367_v57  ;;  %v138_v58 = vld [vmem:[%s137_s2] sm:$0x1] }
 0x66d   :  { %v364_v59 = vpop.f32.mrf.mxu0 }
 0x66e   :  { %v141_v59 = vld [vmem:[%s140_s5] sm:$0x1] }
 0x66f   :  { %v879_v60 = vpop.f32.mrf.mxu0 }
 0x670   :  { %v142_v60 = vadd.f32 %v141_v59, %v138_v58 }
 0x679   :  { %v946_v61 = vpop.eup %945 }
 0x67a   :  { %373 = vrot.lane.b32.xlu1 %v946_v61, %s1086_s25  ;;  %v369_v62 = vmul.f32 0.5, %v946_v61  ;;  %v143_v61 = vadd.f32 %v142_v60, %v1187_v8 }
 0x67c   :  { %v370_v63 = vadd.f32 0.5, %v369_v62 }
 0x67e   :  { %v371_v5 = vmul.f32 %v370_v63, %v313_v46 }
 0x6ec   :  { %v374_v3 = vpop.permute.xlu1 %373 }
 0x6ed   :  { %v376_v4 = vmul.f32 %v374_v3, %v370_v63 }
 0x6ef   :  { %378 = vrot.lane.b32.xlu0 %v376_v4, %s1090_s14 }
 0x761   :  { %v379_v6 = vpop.permute.xlu0 %378 }
 0x762   :  { %v381_v7 = vadd.f32 %v379_v6, %v371_v5 }
 0x764   :  { %947 = vtanh.f32 %v381_v7 }
 0x771   :  { %v948_v9 = vpop.eup %947 }
 0x772   :  { %384 = vrot.lane.b32.xlu1 %v948_v9, %s1086_s25 }
 0x7e4   :  { %v385_v10 = vpop.permute.xlu1 %384 }
 0x7e5   :  { %v387_v11 = vmul.f32 %v385_v10, %v370_v63 }
 0x7e7   :  { %v388_v12 = vpack.c.bf16 %v387_v11, %v387_v11 }
 0x7e9   :  { %390 = vrot.lane.b32.xlu0 %v388_v12, %s1090_s14 }
 0x85b   :  { %v391_v13 = vpop.permute.xlu0 %390 }
 0x85c   :  { %885 = vmatmul.mubr.msk.bf16.vlgmr.msra.gmra.mxu1 %vm179_vm1, %v391_v13 }
 0x85d   :  { %897 = vmatpush3.bf16.msra.mxu1 %v1156_v0  ;;  %900 = vmatprep.mubr.msk.bf16.mxu1 %vm1089_vm0, %v1088_v1 }
 0x85e   :  { %898 = vmatprep.subr.bf16.mxu1 %v1088_v1 }
 0x861   :  { %899 = vmatpush3.bf16.msra.mxu1 %v1161_v2 }
 0x862   :  { %912 = vmatprep.subr.bf16.mxu1 %v1088_v1 }
 0x91c   :  { %v429_v18 = vpop.f32.mrf.mxu1 }
 0x91d   :  { %v435_v19 = vadd.f32 %v429_v18, %v127_v17  ;;  %v146_v17 = vld [vmem:[%s145_s30] sm:$0x1] }
 0x91e   :  { %v886_v20 = vpop.f32.mrf.mxu1  ;;  %v149_v18 = vld [vmem:[%s148_s9] sm:$0x1] }
 0x91f   :  { %949 = vtanh.f32 %v435_v19  ;;  %v150_v19 = vadd.f32 %v149_v18, %v146_v17 }
 0x920   :  { %v432_v21 = vpop.f32.mrf.mxu1 }
 0x921   :  { %v151_v20 = vadd.f32 %v150_v19, %v1187_v8 }
 0x922   :  { %v887_v22 = vpop.f32.mrf.mxu1 }
 0x92c   :  { %v950_v23 = vpop.eup %949 }
 0x92d   :  { %441 = vrot.lane.b32.xlu1 %v950_v23, %s1086_s25  ;;  %v437_v24 = vmul.f32 0.5, %v950_v23 }
 0x92f   :  { %v438_v25 = vadd.f32 0.5, %v437_v24 }
 0x931   :  { %v439_v28 = vmul.f32 %v438_v25, %v381_v7 }
 0x99f   :  { %v442_v26 = vpop.permute.xlu1 %441 }
 0x9a0   :  { %v444_v27 = vmul.f32 %v442_v26, %v438_v25 }
 0x9a2   :  { %446 = vrot.lane.b32.xlu0 %v444_v27, %s1090_s14 }
 0xa14   :  { %v447_v29 = vpop.permute.xlu0 %446 }
 0xa15   :  { %v449_v30 = vadd.f32 %v447_v29, %v439_v28 }
 0xa17   :  { %951 = vtanh.f32 %v449_v30 }
 0xa24   :  { %v952_v31 = vpop.eup %951 }
 0xa25   :  { %452 = vrot.lane.b32.xlu1 %v952_v31, %s1086_s25 }
 0xa97   :  { %v453_v32 = vpop.permute.xlu1 %452 }
 0xa98   :  { %v455_v33 = vmul.f32 %v453_v32, %v438_v25 }
 0xa9a   :  { %v456_v34 = vpack.c.bf16 %v455_v33, %v455_v33 }
 0xa9c   :  { %458 = vrot.lane.b32.xlu0 %v456_v34, %s1090_s14 }
 0xb0e   :  { %v459_v35 = vpop.permute.xlu0 %458 }
 0xb0f   :  { %893 = vmatmul.mubr.msk.bf16.vlgmr.msra.gmra.mxu0 %vm179_vm1, %v459_v35 }
 0xb10   :  { %905 = vmatpush3.bf16.msra.mxu0 %v1156_v0  ;;  %908 = vmatprep.mubr.msk.bf16.mxu0 %vm1089_vm0, %v1088_v1 }
 0xb11   :  { %906 = vmatprep.subr.bf16.mxu0 %v1088_v1 }
 0xb14   :  { %907 = vmatpush3.bf16.msra.mxu0 %v1161_v2 }
 0xbcf   :  { %v497_v40 = vpop.f32.mrf.mxu0 }
 0xbd0   :  { %v503_v41 = vadd.f32 %v497_v40, %v135_v39  ;;  %v154_v39 = vld [vmem:[%s153_s12] sm:$0x1] }
 0xbd1   :  { %v894_v42 = vpop.f32.mrf.mxu0  ;;  %v157_v40 = vld [vmem:[%s156_s13] sm:$0x1] }
 0xbd2   :  { %953 = vtanh.f32 %v503_v41  ;;  %v158_v41 = vadd.f32 %v157_v40, %v154_v39 }
 0xbd3   :  { %v500_v43 = vpop.f32.mrf.mxu0 }
 0xbd4   :  { %v159_v42 = vadd.f32 %v158_v41, %v1187_v8 }
 0xbd5   :  { %v895_v44 = vpop.f32.mrf.mxu0 }
 0xbdf   :  { %v954_v45 = vpop.eup %953 }
 0xbe0   :  { %509 = vrot.lane.b32.xlu1 %v954_v45, %s1086_s25  ;;  %v505_v46 = vmul.f32 0.5, %v954_v45 }
 0xbe2   :  { %v506_v47 = vadd.f32 0.5, %v505_v46 }
 0xbe4   :  { %v507_v50 = vmul.f32 %v506_v47, %v449_v30 }
 0xc52   :  { %v510_v48 = vpop.permute.xlu1 %509 }
 0xc53   :  { %v512_v49 = vmul.f32 %v510_v48, %v506_v47 }
 0xc55   :  { %514 = vrot.lane.b32.xlu0 %v512_v49, %s1090_s14 }
 0xcc7   :  { %v515_v51 = vpop.permute.xlu0 %514 }
 0xcc8   :  { %v517_v52 = vadd.f32 %v515_v51, %v507_v50 }
 0xcca   :  { %955 = vtanh.f32 %v517_v52 }
 0xcd7   :  { %v956_v53 = vpop.eup %955 }
 0xcd8   :  { %520 = vrot.lane.b32.xlu1 %v956_v53, %s1086_s25 }
 0xd4a   :  { %v521_v54 = vpop.permute.xlu1 %520 }
 0xd4b   :  { %v1244_v55 = vmul.f32 %v521_v54, %v506_v47 }
 0xd4d   :  { %v524_v56 = vpack.c.bf16 %v1244_v55, %v1244_v55 }
 0xd4f   :  { %526 = vrot.lane.b32.xlu0 %v524_v56, %s1090_s14 }
 0xdc1   :  { %v527_v57 = vpop.permute.xlu0 %526 }
 0xdc2   :  { %901 = vmatmul.mubr.msk.bf16.vlgmr.msra.gmra.mxu1 %vm179_vm1, %v527_v57 }
 0xdc3   :  { %913 = vmatpush3.bf16.msra.mxu1 %v1156_v0  ;;  %916 = vmatprep.mubr.msk.bf16.mxu1 %vm1089_vm0, %v1088_v1 }
 0xdc4   :  { %914 = vmatprep.subr.bf16.mxu1 %v1088_v1 }
 0xdc7   :  { %915 = vmatpush3.bf16.msra.mxu1 %v1161_v2 }
 0xe82   :  { %v565_v62 = vpop.f32.mrf.mxu1 }
 0xe83   :  { %v571_v63 = vadd.f32 %v565_v62, %v143_v61  ;;  %v1092_v61 = vmov 1966171168   ;;  %v756_v62 = vlaneseq }
 0xe84   :  { %v902_v3 = vpop.f32.mrf.mxu1 }
 0xe85   :  { %957 = vtanh.f32 %v571_v63  ;;  %vm770_vm4 = vcmp.lt.s32.totalorder %v756_v62, 192 }
 0xe86   :  { %v568_v0 = vpop.f32.mrf.mxu1 }
 0xe87   :  { %v757_v0 = vshrl.u32 %v756_v62, 7 }
 0xe88   :  { %v903_v4 = vpop.f32.mrf.mxu1 }
 0xe92   :  { %v958_v5 = vpop.eup %957 }
 0xe93   :  { %577 = vrot.lane.b32.xlu1 %v958_v5, %s1086_s25  ;;  %v573_v1 = vmul.f32 0.5, %v958_v5 }
 0xe95   :  { %v574_v2 = vadd.f32 0.5, %v573_v1 }
 0xe97   :  { %v575_v9 = vmul.f32 %v574_v2, %v517_v52 }
 0xf05   :  { %v578_v6 = vpop.permute.xlu1 %577 }
 0xf06   :  { %v580_v7 = vmul.f32 %v578_v6, %v574_v2 }
 0xf08   :  { %582 = vrot.lane.b32.xlu0 %v580_v7, %s1090_s14 }
 0xf7a   :  { %v583_v10 = vpop.permute.xlu0 %582 }
 0xf7b   :  { %v585_v11 = vadd.f32 %v583_v10, %v575_v9 }
 0xf7d   :  { %959 = vtanh.f32 %v585_v11 }
 0xf8a   :  { %v960_v12 = vpop.eup %959 }
 0xf8b   :  { %588 = vrot.lane.b32.xlu1 %v960_v12, %s1086_s25 }
 0xffd   :  { %v589_v13 = vpop.permute.xlu1 %588 }
 0xffe   :  { %v1259_v14 = vmul.f32 %v589_v13, %v574_v2 }
0x1000   :  { %v592_v15 = vpack.c.bf16 %v1259_v14, %v1259_v14 }
0x1002   :  { %594 = vrot.lane.b32.xlu0 %v592_v15, %s1090_s14 }
0x1074   :  { %v595_v16 = vpop.permute.xlu0 %594 }
0x1075   :  { %909 = vmatmul.mubr.msk.bf16.vlgmr.msra.gmra.mxu0 %vm179_vm1, %v595_v16 }
0x1135   :  { %v633_v21 = vpop.f32.mrf.mxu0 }
0x1136   :  { %v639_v22 = vadd.f32 %v633_v21, %v151_v20 }
0x1137   :  { %v910_v23 = vpop.f32.mrf.mxu0 }
0x1138   :  { %961 = vtanh.f32 %v639_v22 }
0x1139   :  { %v636_v24 = vpop.f32.mrf.mxu0 }
0x113b   :  { %v911_v25 = vpop.f32.mrf.mxu0 }
0x1145   :  { %v962_v26 = vpop.eup %961 }
0x1146   :  { %645 = vrot.lane.b32.xlu1 %v962_v26, %s1086_s25  ;;  %v641_v27 = vmul.f32 0.5, %v962_v26 }
0x1148   :  { %v642_v28 = vadd.f32 0.5, %v641_v27 }
0x114a   :  { %v643_v31 = vmul.f32 %v642_v28, %v585_v11 }
0x11b8   :  { %v646_v29 = vpop.permute.xlu1 %645 }
0x11b9   :  { %v648_v30 = vmul.f32 %v646_v29, %v642_v28 }
0x11bb   :  { %650 = vrot.lane.b32.xlu0 %v648_v30, %s1090_s14 }
0x122d   :  { %v651_v32 = vpop.permute.xlu0 %650 }
0x122e   :  { %v653_v33 = vadd.f32 %v651_v32, %v643_v31 }
0x1230   :  { %963 = vtanh.f32 %v653_v33 }
0x123d   :  { %v964_v34 = vpop.eup %963 }
0x123e   :  { %656 = vrot.lane.b32.xlu1 %v964_v34, %s1086_s25 }
0x12b0   :  { %v657_v35 = vpop.permute.xlu1 %656 }
0x12b1   :  { %v659_v36 = vmul.f32 %v657_v35, %v642_v28 }
0x12b3   :  { %v660_v37 = vpack.c.bf16 %v659_v36, %v659_v36 }
0x12b5   :  { %662 = vrot.lane.b32.xlu0 %v660_v37, %s1090_s14 }
0x1327   :  { %v663_v38 = vpop.permute.xlu0 %662 }
0x1328   :  { %917 = vmatmul.mubr.msk.bf16.vlgmr.msra.gmra.mxu1 %vm179_vm1, %v663_v38 }
0x13e8   :  { %v701_v43 = vpop.f32.mrf.mxu1 }
0x13e9   :  { %v707_v44 = vadd.f32 %v701_v43, %v159_v42 }
0x13ea   :  { %v918_v45 = vpop.f32.mrf.mxu1 }
0x13eb   :  { %965 = vtanh.f32 %v707_v44 }
0x13ec   :  { %v704_v46 = vpop.f32.mrf.mxu1 }
0x13ee   :  { %v919_v47 = vpop.f32.mrf.mxu1 }
0x13f8   :  { %v966_v48 = vpop.eup %965 }
0x13f9   :  { %713 = vrot.lane.b32.xlu1 %v966_v48, %s1086_s25  ;;  %v709_v49 = vmul.f32 0.5, %v966_v48 }
0x13fb   :  { %v710_v50 = vadd.f32 0.5, %v709_v49 }
0x13fd   :  { %v711_v8 = vmul.f32 %v710_v50, %v653_v33 }
0x146b   :  { %v714_v51 = vpop.permute.xlu1 %713 }
0x146c   :  { %v716_v52 = vmul.f32 %v714_v51, %v710_v50 }
0x146e   :  { %718 = vrot.lane.b32.xlu0 %v716_v52, %s1090_s14 }
0x1472   :  { %729 = vrot.lane.b32.xlu0 %v1244_v55, %s1090_s14  ;;  %v754_v55 = vunpack.c.l.s4 %v1092_v61 }
0x1474   :  { %v755_v3 = vunpack.c.0.s8 %v754_v55 }
0x1476   :  { %737 = vrot.lane.b32.xlu0 %v659_v36, %s1091_s4  ;;  %v758_v2 = vsub.s32 %v755_v3, %v757_v0 }
0x14e0   :  { %v719_v53 = vpop.permute.xlu0 %718 }
0x14e1   :  { %v721_v54 = vadd.f32 %v719_v53, %v711_v8 }
0x14e3   :  { %967 = vtanh.f32 %v721_v54 }
0x14e4   :  { %v730_v59 = vpop.permute.xlu0 %729 }
0x14e8   :  { %v738_v4 = vpop.permute.xlu0 %737 }
0x14f0   :  { %v968_v56 = vpop.eup %967 }
0x14f1   :  { %724 = vrot.lane.b32.xlu1 %v968_v56, %s1086_s25 }
0x14f5   :  { %733 = vrot.lane.b32.xlu1 %v1259_v14, %s1086_s25  ;;  %s1093_s25 = smov [#allocation12]  }
0x1563   :  { %v725_v57 = vpop.permute.xlu1 %724 }
0x1564   :  { %v727_v58 = vmul.f32 %v725_v57, %v710_v50 }
0x1566   :  { %741 = vrot.lane.b32.xlu1 %v727_v58, %s1090_s14  ;;  %s779_s14 = sshll.u32 %s1093_s25, 4  ;;  %s780_s14 = int_to_ptr.vmem [resolvable:$true] %s779_s14 }
0x1567   :  { %v734_v60 = vpop.permute.xlu1 %733  ;;  %s1049_s7 = scalar_lea.vmem %s780_s14, 32  ;;  %p1054_p7 = scmp.lt.s32.totalorder %s780_s14, %s780_s14 }
0x1568   :  { %v744_v63 = vsel %vm179_vm1, %v730_v59, %v734_v60  ;;  %p1050_p6 = scmp.ne.s32.totalorder %s780_s14, %s1049_s7  ;;  %p1055_p8 = scmp.lt.s32.totalorder %s1049_s7, %s1049_s7 }
0x1569   :  { %v746_v5 = vsel %vm745_vm2, %v744_v63, %v738_v4 }
0x156a   :  { %v748_v6 = vsel %vm747_vm3, %v746_v5, %v727_v58  ;;  %p1056_p9 = por %p1055_p8, %p1054_p7 }
0x156c   :  { %p1057_p10 = pnand %p1056_p9, %p1050_p6 }
0x15d8   :  { %v742_v1 = vpop.permute.xlu1 %741 }
0x15d9   :  { %v749_v7 = vsel %vm179_vm1, %v742_v1, %v721_v54 }
0x15da   :  { %v752_v9 = vcombine.low %v748_v6, %v749_v7 }
0x15dc   :  { %v759_v10 = vrot.slane %v752_v9, %v758_v2 }
0x15de   :  { %v766_v11 = vrot.slane %v759_v10, %v758_v2 }
0x15e0   :  { %772 = vst.msk [vmem:[#allocation12] sm:$0x3] %vm770_vm4, %v766_v11 }
0x15e1   :  { %1060 = shalt.err (!%p1057_p10)
}
0x15e2   :  { %782 = dma.vmem_to_hbm [thread:$0]  %s780_s14, 32, %s1293_s8, [#allocation4]  }
0x15e3   :  { %1077 = dma.done.wait [#allocation4], 32  }
0x15e4   :  { %1078 = vsyncadd [#allocation4], 4294967264 }
0x15e5   :  { %786 = vsyncpa [#allocation3], 1 }
0x15e6   :  { %787 = vsyncpa [#allocation10], 1 }
0x15e7   :  { %788 = vsyncpa [#allocation4], 1 }
0x15e8   :  { %789 = vsyncpa [#allocation5], 1 }
0x15e9   :  { %790 = vsyncpa [#allocation6], 1 }

</bundles_post_ra>
